<compile_context>
chip_gen: v6e
topology: v6e:2x2x1
jax: 0.10.0
libtpu: 0.0.40
codegen_flags: <defaults>
</compile_context>

<pallas_src>
import jax
import jax.numpy as jnp
from jax.experimental import pallas as pl
from jax.experimental.pallas import tpu as pltpu

IN_FEATURES = 5
OUT_FEATURES = 4
ADD_ONE = True          # corresponds to args.add_one
LINEAR_NO_BIAS = False  # corresponds to args.linear_no_bias

# Batch tile (sublane axis).  Multiple of 8; big enough to amortize the
# ~0.35us per-grid-step overhead.  A [TB, 5] f32 block pads its minor dim to
# 128 lanes in VMEM -> TB*512 B per buffer; TB=2048 => ~1 MiB per buffer,
# ~4 MiB total with double-buffered in/out, comfortably inside scoped VMEM
# on v5e / v6e / v7x.
DEFAULT_BLOCK_B = 2048


def _linear_kernel_bias(x_ref, wt_ref, b_ref, o_ref):
    # x_ref: [TB, IN], wt_ref: [IN, OUT], b_ref: [1, OUT], o_ref: [TB, OUT]
    acc = jnp.dot(x_ref[...], wt_ref[...], preferred_element_type=jnp.float32)
    acc = acc + b_ref[...]            # single epilogue add (bias + optional 1.0)
    o_ref[...] = acc.astype(o_ref.dtype)


def _linear_kernel_nobias(x_ref, wt_ref, o_ref):
    acc = jnp.dot(x_ref[...], wt_ref[...], preferred_element_type=jnp.float32)
    o_ref[...] = acc.astype(o_ref.dtype)


def simple_model_forward(x, weight, bias=None, *, add_one=ADD_ONE,
                         use_bias=not LINEAR_NO_BIAS,
                         block_b=DEFAULT_BLOCK_B):
    """x: [B, in], weight: [out, in] (PyTorch layout), bias: [out] or None."""
    B, in_f = x.shape
    out_f = weight.shape[0]
    dtype = x.dtype

    # Fold the Linear bias and the "+1.0" into one effective bias (or none).
    if use_bias:
        if bias is None:
            raise ValueError("use_bias=True requires a bias vector")
        b_eff = bias + 1.0 if add_one else bias
    else:
        b_eff = jnp.ones((out_f,), dtype) if add_one else None
    has_bias = b_eff is not None

    # Only the tiny constant-size weight gets transposed (negligible, one-time).
    w_t = weight.T.astype(dtype)                              # [IN, OUT]

    # Batch tile: whole batch if it fits in one block (block == full array dim
    # is exempt from the (8,128) rule); otherwise a multiple-of-8 tile, with
    # Pallas masking the trailing partial block.
    tb = B if B <= block_b else block_b
    grid = (pl.cdiv(B, tb),)

    in_specs = [
        pl.BlockSpec((tb, in_f), lambda i: (i, 0)),           # x tile (natural layout)
        pl.BlockSpec((in_f, out_f), lambda i: (0, 0)),        # W^T (whole, tiny)
    ]
    args = [x, w_t]
    if has_bias:
        in_specs.append(pl.BlockSpec((1, out_f), lambda i: (0, 0)))  # b_eff (whole)
        args.append(b_eff.reshape(1, out_f).astype(dtype))
        kernel = _linear_kernel_bias
    else:
        kernel = _linear_kernel_nobias

    bytes_accessed = (B * in_f + B * out_f + in_f * out_f
                      + (out_f if has_bias else 0)) * x.dtype.itemsize

    return pl.pallas_call(
        kernel,
        out_shape=jax.ShapeDtypeStruct((B, out_f), dtype),
        grid=grid,
        in_specs=in_specs,
        out_specs=pl.BlockSpec((tb, out_f), lambda i: (i, 0)),
        compiler_params=pltpu.CompilerParams(
            dimension_semantics=("parallel",)),               # batch blocks independent
        cost_estimate=pl.CostEstimate(
            flops=2 * B * in_f * out_f,
            transcendentals=0,
            bytes_accessed=bytes_accessed),
    )(*args)


if __name__ == "__main__":
    key = jax.random.PRNGKey(0)
    kx, kw, kb = jax.random.split(key, 3)

    batch = 256
    x = jax.random.normal(kx, (batch, IN_FEATURES), dtype=jnp.float32)
    # Deterministic synthetic parameters (nn.Linear(5, 4) shapes, PyTorch layout).
    weight = jax.random.normal(kw, (OUT_FEATURES, IN_FEATURES),
                               dtype=jnp.float32) * 0.1
    bias = jax.random.normal(kb, (OUT_FEATURES,), dtype=jnp.float32) * 0.1

    ref = x @ weight.T + bias + 1.0

    # Default config: bias + add_one (args.add_one=True, args.linear_no_bias=False).
    out = jax.block_until_ready(simple_model_forward(x, weight, bias))
    assert out.shape == (batch, OUT_FEATURES)
    assert jnp.allclose(out, ref, atol=1e-5, rtol=1e-5)

    # Multi-tile path: force several grid steps to exercise the batch tiling.
    out_tiled = jax.block_until_ready(
        simple_model_forward(x, weight, bias, block_b=64))
    assert jnp.allclose(out_tiled, ref, atol=1e-5, rtol=1e-5)

    # linear_no_bias=True paths (bias=None is legal there).
    out_nb = jax.block_until_ready(
        simple_model_forward(x, weight, None, add_one=True, use_bias=False))
    assert jnp.allclose(out_nb, x @ weight.T + 1.0, atol=1e-5, rtol=1e-5)

    out_plain = jax.block_until_ready(
        simple_model_forward(x, weight, None, add_one=False, use_bias=False))
    assert jnp.allclose(out_plain, x @ weight.T, atol=1e-5, rtol=1e-5)

    print("KERNEL_OK")
</pallas_src>

<mosaic_0001>
module attributes {stable_mosaic.version = 11 : i64} {
  func.func @_linear_kernel_bias(%arg0: i32, %arg1: memref<256x5xf32, #tpu.memory_space<vmem>>, %arg2: memref<5x4xf32, #tpu.memory_space<vmem>>, %arg3: memref<1x4xf32, #tpu.memory_space<vmem>>, %arg4: memref<256x4xf32, #tpu.memory_space<vmem>>) attributes {dimension_semantics = [#tpu.dimension_semantics<parallel>], iteration_bounds = array<i64: 1>, scalar_prefetch = 0 : i64, scratch_operands = 0 : i64, tpu.core_type = #tpu.core_type<tc>, window_params = [{transform_indices = @transform_0, window_bounds = array<i64: 256, 5>}, {pipeline_mode = #tpu.pipeline_mode<synchronous>, transform_indices = @transform_1, window_bounds = array<i64: 5, 4>}, {pipeline_mode = #tpu.pipeline_mode<synchronous>, transform_indices = @transform_2, window_bounds = array<i64: 1, 4>}, {transform_indices = @transform_3, window_bounds = array<i64: 256, 4>}]} {
    %c0 = arith.constant 0 : index
    %c0_0 = arith.constant 0 : index
    %0 = vector.load %arg1[%c0, %c0_0] : memref<256x5xf32, #tpu.memory_space<vmem>>, vector<256x5xf32>
    %c0_1 = arith.constant 0 : index
    %c0_2 = arith.constant 0 : index
    %1 = vector.load %arg2[%c0_1, %c0_2] : memref<5x4xf32, #tpu.memory_space<vmem>>, vector<5x4xf32>
    %cst = arith.constant dense<0.000000e+00> : vector<256x4xf32>
    %2 = tpu.matmul %0, %1, %cst {dimension_numbers = #tpu.dot_dimension_numbers<[1], [0], [0], [1], [0, 0, 1, 1], [], []>} : vector<256x5xf32>, vector<5x4xf32>, vector<256x4xf32> -> vector<256x4xf32>
    %c0_3 = arith.constant 0 : index
    %c0_4 = arith.constant 0 : index
    %3 = vector.load %arg3[%c0_3, %c0_4] : memref<1x4xf32, #tpu.memory_space<vmem>>, vector<1x4xf32>
    %4 = vector.broadcast %3 : vector<1x4xf32> to vector<256x4xf32>
    %5 = arith.addf %2, %4 : vector<256x4xf32>
    %c0_5 = arith.constant 0 : index
    %c0_6 = arith.constant 0 : index
    %6 = vector.load %arg4[%c0_5, %c0_6] : memref<256x4xf32, #tpu.memory_space<vmem>>, vector<256x4xf32>
    tpu.vector_store %arg4[%c0_5, %c0_6], %5 {strides = array<i32>} : memref<256x4xf32, #tpu.memory_space<vmem>>, vector<256x4xf32>,
    return
  }
  func.func @transform_0(%arg0: i32) -> (i32, i32) {
    %c0_i32 = arith.constant 0 : i32
    %c0_i32_0 = arith.constant 0 : i32
    return %arg0, %c0_i32 : i32, i32
  }
  func.func @transform_1(%arg0: i32) -> (i32, i32) {
    %c0_i32 = arith.constant 0 : i32
    %c0_i32_0 = arith.constant 0 : i32
    %c0_i32_1 = arith.constant 0 : i32
    return %c0_i32, %c0_i32_0 : i32, i32
  }
  func.func @transform_2(%arg0: i32) -> (i32, i32) {
    %c0_i32 = arith.constant 0 : i32
    %c0_i32_0 = arith.constant 0 : i32
    %c0_i32_1 = arith.constant 0 : i32
    return %c0_i32, %c0_i32_0 : i32, i32
  }
  func.func @transform_3(%arg0: i32) -> (i32, i32) {
    %c0_i32 = arith.constant 0 : i32
    %c0_i32_0 = arith.constant 0 : i32
    return %arg0, %c0_i32 : i32, i32
  }
}

</mosaic_0001>

<bundles_post_ra>
// kernel: tpu_custom_call.1
= control target key start
LH: loop header
LB: loop body
LE: loop exit
PB: predicated region body
PF: predicated region fallthrough
CT: control target
= control target key end

     0   :  { %vm151_vm0 = vcmask 1044480   ;;  %vm54_vm1 = vcmask 39936   ;;  %vm380_vm2 = vcmask 31744   ;;  %s852_s1 = inlined_call_operand.vmem [shape: f32[5,4], index: 1, kind: input, shape index: {}]   ;;  %s853_s0 = inlined_call_operand.vmem [shape: f32[256,5], index: 0, kind: input, shape index: {}]   ;;  %s854_s2 = inlined_call_operand.vmem [shape: f32[1,4], index: 2, kind: input, shape index: {}]   ;;  %s855_s3 = inlined_call_operand.vmem [shape: f32[256,4], index: 3, kind: output, shape index: {}]  }
   0x1   :  { %v46_v0 = vld [vmem:[%s852_s1] sm:$0x1f]  ;;  %v15_v3 = vld [vmem:[%s853_s0 + $0x8] sm:$0xff]  ;;  %v16_v5 = vld [vmem:[%s853_s0 + $0x10] sm:$0xff] }
   0x2   :  { %v14_v1 = vld [vmem:[%s853_s0] sm:$0xff]  ;;  %484 = vmatprep.subr.msk.mxu0 %vm151_vm0, %v46_v0  ;;  %534 = vmatprep.subr.msk.mxu1 %vm151_vm0, %v46_v0  ;;  %v31_v4 = vld [vmem:[%s853_s0 + $0x88] sm:$0xff]  ;;  %v32_v6 = vld [vmem:[%s853_s0 + $0x90] sm:$0xff] }
   0x3   :  { %v30_v2 = vld [vmem:[%s853_s0 + $0x80] sm:$0xff]  ;;  %485 = vmatpush3.msk.msra.mxu0 %vm151_vm0, %v46_v0  ;;  %535 = vmatpush3.msk.msra.mxu1 %vm151_vm0, %v46_v0  ;;  %v17_v7 = vld [vmem:[%s853_s0 + $0x18] sm:$0xff]  ;;  %v19_v11 = vld [vmem:[%s853_s0 + $0x28] sm:$0xff] }
   0x4   :  { %486 = vmatprep.mubr.msk.f32.mxu0 %vm54_vm1, %v14_v1  ;;  %510 = vmatprep.mubr.msk.f32.mxu1 %vm54_vm1, %v30_v2  ;;  %v33_v8 = vld [vmem:[%s853_s0 + $0x98] sm:$0xff]  ;;  %v18_v9 = vld [vmem:[%s853_s0 + $0x20] sm:$0xff]  ;;  %v35_v12 = vld [vmem:[%s853_s0 + $0xa8] sm:$0xff] }
   0x5   :  { %487 = vmatmul.mubr.msk.f32.vlgmr.msra.gmra.mxu0 %vm54_vm1, %v15_v3  ;;  %511 = vmatmul.mubr.msk.f32.vlgmr.msra.gmra.mxu1 %vm54_vm1, %v31_v4  ;;  %v34_v10 = vld [vmem:[%s853_s0 + $0xa0] sm:$0xff]  ;;  %v20_v13 = vld [vmem:[%s853_s0 + $0x30] sm:$0xff]  ;;  %v21_v15 = vld [vmem:[%s853_s0 + $0x38] sm:$0xff] }
   0x6   :  { %489 = vmatprep.mubr.msk.f32.mxu0 %vm54_vm1, %v16_v5  ;;  %513 = vmatprep.mubr.msk.f32.mxu1 %vm54_vm1, %v32_v6  ;;  %v36_v14 = vld [vmem:[%s853_s0 + $0xb0] sm:$0xff]  ;;  %v37_v16 = vld [vmem:[%s853_s0 + $0xb8] sm:$0xff]  ;;  %v22_v17 = vld [vmem:[%s853_s0 + $0x40] sm:$0xff] }
   0x7   :  { %v38_v18 = vld [vmem:[%s853_s0 + $0xc0] sm:$0xff]  ;;  %v23_v19 = vld [vmem:[%s853_s0 + $0x48] sm:$0xff]  ;;  %v24_v21 = vld [vmem:[%s853_s0 + $0x50] sm:$0xff] }
   0x8   :  { %v39_v20 = vld [vmem:[%s853_s0 + $0xc8] sm:$0xff]  ;;  %v40_v22 = vld [vmem:[%s853_s0 + $0xd0] sm:$0xff]  ;;  %v25_v23 = vld [vmem:[%s853_s0 + $0x58] sm:$0xff] }
   0x9   :  { %490 = vmatmul.mubr.msk.f32.gmra.mxu0 %vm54_vm1, %v17_v7  ;;  %514 = vmatmul.mubr.msk.f32.gmra.mxu1 %vm54_vm1, %v33_v8  ;;  %v41_v24 = vld [vmem:[%s853_s0 + $0xd8] sm:$0xff]  ;;  %v26_v25 = vld [vmem:[%s853_s0 + $0x60] sm:$0xff]  ;;  %v27_v27 = vld [vmem:[%s853_s0 + $0x68] sm:$0xff] }
   0xa   :  { %492 = vmatprep.mubr.msk.f32.mxu0 %vm54_vm1, %v18_v9  ;;  %516 = vmatprep.mubr.msk.f32.mxu1 %vm54_vm1, %v34_v10  ;;  %v42_v26 = vld [vmem:[%s853_s0 + $0xe0] sm:$0xff]  ;;  %v43_v28 = vld [vmem:[%s853_s0 + $0xe8] sm:$0xff]  ;;  %v28_v29 = vld [vmem:[%s853_s0 + $0x70] sm:$0xff] }
   0xb   :  { %v44_v30 = vld [vmem:[%s853_s0 + $0xf0] sm:$0xff]  ;;  %v29_v31 = vld [vmem:[%s853_s0 + $0x78] sm:$0xff]  ;;  %v690_v33 = vld [vmem:[%s854_s2] ss:$0 sm:$0xff] }
   0xc   :  { %v45_v32 = vld [vmem:[%s853_s0 + $0xf8] sm:$0xff] }
   0xd   :  { %493 = vmatmul.mubr.msk.f32.gmra.mxu0 %vm54_vm1, %v19_v11  ;;  %517 = vmatmul.mubr.msk.f32.gmra.mxu1 %vm54_vm1, %v35_v12 }
   0xe   :  { %495 = vmatprep.mubr.msk.f32.mxu0 %vm54_vm1, %v20_v13  ;;  %519 = vmatprep.mubr.msk.f32.mxu1 %vm54_vm1, %v36_v14 }
  0x11   :  { %496 = vmatmul.mubr.msk.f32.gmra.mxu0 %vm54_vm1, %v21_v15  ;;  %520 = vmatmul.mubr.msk.f32.gmra.mxu1 %vm54_vm1, %v37_v16 }
  0x12   :  { %498 = vmatprep.mubr.msk.f32.mxu0 %vm54_vm1, %v22_v17  ;;  %522 = vmatprep.mubr.msk.f32.mxu1 %vm54_vm1, %v38_v18 }
  0x15   :  { %499 = vmatmul.mubr.msk.f32.gmra.mxu0 %vm54_vm1, %v23_v19  ;;  %523 = vmatmul.mubr.msk.f32.gmra.mxu1 %vm54_vm1, %v39_v20 }
  0x16   :  { %501 = vmatprep.mubr.msk.f32.mxu0 %vm54_vm1, %v24_v21  ;;  %525 = vmatprep.mubr.msk.f32.mxu1 %vm54_vm1, %v40_v22 }
  0x19   :  { %502 = vmatmul.mubr.msk.f32.gmra.mxu0 %vm54_vm1, %v25_v23  ;;  %526 = vmatmul.mubr.msk.f32.gmra.mxu1 %vm54_vm1, %v41_v24 }
  0x1a   :  { %504 = vmatprep.mubr.msk.f32.mxu0 %vm54_vm1, %v26_v25  ;;  %528 = vmatprep.mubr.msk.f32.mxu1 %vm54_vm1, %v42_v26 }
  0x1d   :  { %505 = vmatmul.mubr.msk.f32.gmra.mxu0 %vm54_vm1, %v27_v27  ;;  %529 = vmatmul.mubr.msk.f32.gmra.mxu1 %vm54_vm1, %v43_v28 }
  0x1e   :  { %507 = vmatprep.mubr.msk.f32.mxu0 %vm54_vm1, %v28_v29  ;;  %531 = vmatprep.mubr.msk.f32.mxu1 %vm54_vm1, %v44_v30 }
  0x21   :  { %508 = vmatmul.mubr.msk.f32.gmra.mxu0 %vm54_vm1, %v29_v31  ;;  %532 = vmatmul.mubr.msk.f32.gmra.mxu1 %vm54_vm1, %v45_v32 }
  0xc5   :  { %v488_v34 = vpop.f32.mrf.mxu0  ;;  %v512_v35 = vpop.f32.mrf.mxu1 }
  0xc6   :  { %v227_v36 = vadd.f32 %v488_v34, %v690_v33  ;;  %v307_v37 = vadd.f32 %v512_v35, %v690_v33 }
  0xc7   :  { %v221_v38 = vpop.f32.mrf.mxu0  ;;  %v301_v39 = vpop.f32.mrf.mxu1 }
  0xc8   :  { %382 = vst.msk [vmem:[%s855_s3 + $0x8] sm:$0xff] %vm380_vm2, %v227_v36  ;;  %398 = vst.msk [vmem:[%s855_s3 + $0x88] sm:$0xff] %vm380_vm2, %v307_v37  ;;  %v222_v40 = vadd.f32 %v690_v33, %v221_v38  ;;  %v302_v41 = vadd.f32 %v690_v33, %v301_v39 }
  0xc9   :  { %v491_v42 = vpop.f32.mrf.mxu0  ;;  %v515_v43 = vpop.f32.mrf.mxu1 }
  0xca   :  { %381 = vst.msk [vmem:[%s855_s3] sm:$0xff] %vm380_vm2, %v222_v40  ;;  %397 = vst.msk [vmem:[%s855_s3 + $0x80] sm:$0xff] %vm380_vm2, %v302_v41  ;;  %v237_v44 = vadd.f32 %v491_v42, %v690_v33  ;;  %v317_v45 = vadd.f32 %v515_v43, %v690_v33 }
  0xcb   :  { %v231_v46 = vpop.f32.mrf.mxu0  ;;  %v311_v47 = vpop.f32.mrf.mxu1 }
  0xcc   :  { %384 = vst.msk [vmem:[%s855_s3 + $0x18] sm:$0xff] %vm380_vm2, %v237_v44  ;;  %400 = vst.msk [vmem:[%s855_s3 + $0x98] sm:$0xff] %vm380_vm2, %v317_v45  ;;  %v232_v48 = vadd.f32 %v690_v33, %v231_v46  ;;  %v312_v49 = vadd.f32 %v690_v33, %v311_v47 }
  0xcd   :  { %v494_v50 = vpop.f32.mrf.mxu0  ;;  %v518_v51 = vpop.f32.mrf.mxu1 }
  0xce   :  { %383 = vst.msk [vmem:[%s855_s3 + $0x10] sm:$0xff] %vm380_vm2, %v232_v48  ;;  %399 = vst.msk [vmem:[%s855_s3 + $0x90] sm:$0xff] %vm380_vm2, %v312_v49  ;;  %v247_v52 = vadd.f32 %v494_v50, %v690_v33  ;;  %v327_v53 = vadd.f32 %v518_v51, %v690_v33 }
  0xcf   :  { %v241_v54 = vpop.f32.mrf.mxu0  ;;  %v321_v55 = vpop.f32.mrf.mxu1 }
  0xd0   :  { %386 = vst.msk [vmem:[%s855_s3 + $0x28] sm:$0xff] %vm380_vm2, %v247_v52  ;;  %402 = vst.msk [vmem:[%s855_s3 + $0xa8] sm:$0xff] %vm380_vm2, %v327_v53  ;;  %v242_v56 = vadd.f32 %v690_v33, %v241_v54  ;;  %v322_v57 = vadd.f32 %v690_v33, %v321_v55 }
  0xd1   :  { %v497_v58 = vpop.f32.mrf.mxu0  ;;  %v521_v59 = vpop.f32.mrf.mxu1 }
  0xd2   :  { %385 = vst.msk [vmem:[%s855_s3 + $0x20] sm:$0xff] %vm380_vm2, %v242_v56  ;;  %401 = vst.msk [vmem:[%s855_s3 + $0xa0] sm:$0xff] %vm380_vm2, %v322_v57  ;;  %v257_v60 = vadd.f32 %v497_v58, %v690_v33  ;;  %v337_v61 = vadd.f32 %v521_v59, %v690_v33 }
  0xd3   :  { %v251_v62 = vpop.f32.mrf.mxu0  ;;  %v331_v63 = vpop.f32.mrf.mxu1 }
  0xd4   :  { %388 = vst.msk [vmem:[%s855_s3 + $0x38] sm:$0xff] %vm380_vm2, %v257_v60  ;;  %404 = vst.msk [vmem:[%s855_s3 + $0xb8] sm:$0xff] %vm380_vm2, %v337_v61  ;;  %v252_v0 = vadd.f32 %v690_v33, %v251_v62  ;;  %v332_v1 = vadd.f32 %v690_v33, %v331_v63 }
  0xd5   :  { %v500_v2 = vpop.f32.mrf.mxu0  ;;  %v524_v3 = vpop.f32.mrf.mxu1 }
  0xd6   :  { %387 = vst.msk [vmem:[%s855_s3 + $0x30] sm:$0xff] %vm380_vm2, %v252_v0  ;;  %403 = vst.msk [vmem:[%s855_s3 + $0xb0] sm:$0xff] %vm380_vm2, %v332_v1  ;;  %v267_v4 = vadd.f32 %v500_v2, %v690_v33  ;;  %v347_v5 = vadd.f32 %v524_v3, %v690_v33 }
  0xd7   :  { %v261_v6 = vpop.f32.mrf.mxu0  ;;  %v341_v7 = vpop.f32.mrf.mxu1 }
  0xd8   :  { %390 = vst.msk [vmem:[%s855_s3 + $0x48] sm:$0xff] %vm380_vm2, %v267_v4  ;;  %406 = vst.msk [vmem:[%s855_s3 + $0xc8] sm:$0xff] %vm380_vm2, %v347_v5  ;;  %v262_v8 = vadd.f32 %v690_v33, %v261_v6  ;;  %v342_v9 = vadd.f32 %v690_v33, %v341_v7 }
  0xd9   :  { %v503_v10 = vpop.f32.mrf.mxu0  ;;  %v527_v11 = vpop.f32.mrf.mxu1 }
  0xda   :  { %389 = vst.msk [vmem:[%s855_s3 + $0x40] sm:$0xff] %vm380_vm2, %v262_v8  ;;  %405 = vst.msk [vmem:[%s855_s3 + $0xc0] sm:$0xff] %vm380_vm2, %v342_v9  ;;  %v277_v12 = vadd.f32 %v503_v10, %v690_v33  ;;  %v357_v13 = vadd.f32 %v527_v11, %v690_v33 }
  0xdb   :  { %v271_v14 = vpop.f32.mrf.mxu0  ;;  %v351_v15 = vpop.f32.mrf.mxu1 }
  0xdc   :  { %392 = vst.msk [vmem:[%s855_s3 + $0x58] sm:$0xff] %vm380_vm2, %v277_v12  ;;  %408 = vst.msk [vmem:[%s855_s3 + $0xd8] sm:$0xff] %vm380_vm2, %v357_v13  ;;  %v272_v16 = vadd.f32 %v690_v33, %v271_v14  ;;  %v352_v17 = vadd.f32 %v690_v33, %v351_v15 }
  0xdd   :  { %v506_v18 = vpop.f32.mrf.mxu0  ;;  %v530_v19 = vpop.f32.mrf.mxu1 }
  0xde   :  { %391 = vst.msk [vmem:[%s855_s3 + $0x50] sm:$0xff] %vm380_vm2, %v272_v16  ;;  %407 = vst.msk [vmem:[%s855_s3 + $0xd0] sm:$0xff] %vm380_vm2, %v352_v17  ;;  %v287_v20 = vadd.f32 %v506_v18, %v690_v33  ;;  %v367_v21 = vadd.f32 %v530_v19, %v690_v33 }
  0xdf   :  { %v281_v22 = vpop.f32.mrf.mxu0  ;;  %v361_v23 = vpop.f32.mrf.mxu1 }
  0xe0   :  { %394 = vst.msk [vmem:[%s855_s3 + $0x68] sm:$0xff] %vm380_vm2, %v287_v20  ;;  %410 = vst.msk [vmem:[%s855_s3 + $0xe8] sm:$0xff] %vm380_vm2, %v367_v21  ;;  %v282_v24 = vadd.f32 %v690_v33, %v281_v22  ;;  %v362_v25 = vadd.f32 %v690_v33, %v361_v23 }
  0xe1   :  { %v509_v26 = vpop.f32.mrf.mxu0  ;;  %v533_v27 = vpop.f32.mrf.mxu1 }
  0xe2   :  { %393 = vst.msk [vmem:[%s855_s3 + $0x60] sm:$0xff] %vm380_vm2, %v282_v24  ;;  %409 = vst.msk [vmem:[%s855_s3 + $0xe0] sm:$0xff] %vm380_vm2, %v362_v25  ;;  %v297_v28 = vadd.f32 %v509_v26, %v690_v33  ;;  %v377_v29 = vadd.f32 %v533_v27, %v690_v33 }
  0xe3   :  { %v291_v30 = vpop.f32.mrf.mxu0  ;;  %v371_v31 = vpop.f32.mrf.mxu1 }
  0xe4   :  { %396 = vst.msk [vmem:[%s855_s3 + $0x78] sm:$0xff] %vm380_vm2, %v297_v28  ;;  %412 = vst.msk [vmem:[%s855_s3 + $0xf8] sm:$0xff] %vm380_vm2, %v377_v29  ;;  %v292_v32 = vadd.f32 %v690_v33, %v291_v30  ;;  %v372_v34 = vadd.f32 %v690_v33, %v371_v31 }
  0xe6   :  { %395 = vst.msk [vmem:[%s855_s3 + $0x70] sm:$0xff] %vm380_vm2, %v292_v32  ;;  %411 = vst.msk [vmem:[%s855_s3 + $0xf0] sm:$0xff] %vm380_vm2, %v372_v34 }

</bundles_post_ra>
